<compile_context>
chip_gen: v6e
topology: v6e:2x2x1
jax: 0.10.0
libtpu: 0.0.40
codegen_flags: <defaults>
</compile_context>

<pallas_src>
import math
import functools

import jax
import jax.numpy as jnp
from jax import lax
from jax.experimental import pallas as pl
from jax.experimental.pallas import tpu as pltpu


def _self_attention_kernel(x_ref, mask_ref, wqkv_ref, bqkv_ref, out_ref,
                           *, num_heads, head_size, hidden_size):
    """One grid step = one batch element.

    x_ref    : [1, S, H]   VMEM (activations, f32)
    mask_ref : [1, 1, S]   VMEM (additive attention mask, f32)
    wqkv_ref : [H, 3H]     VMEM (pre-transposed, Q columns pre-scaled, bf16)
    bqkv_ref : [1, 3H]     VMEM (fused bias, Q part pre-scaled, f32)
    out_ref  : [1, S, H]   VMEM
    """
    H = hidden_size
    mxu_dtype = wqkv_ref.dtype

    x = x_ref[0]                                    # [S, H]

    # Fused Q/K/V projection: one MXU matmul, weights already [in, out] and
    # scale already folded in -> no .T, no per-score multiply.
    qkv = jnp.dot(x.astype(mxu_dtype), wqkv_ref[...],
                  preferred_element_type=jnp.float32) + bqkv_ref[...]   # [S, 3H] f32
    q = qkv[:, 0:H]
    k = qkv[:, H:2 * H]
    v = qkv[:, 2 * H:3 * H]

    mask = mask_ref[0]                              # [1, S], broadcasts over query rows

    # Static unroll over heads; each head's context is written straight into
    # its lane slice of the output (no concatenate, no extra live buffers).
    for h in range(num_heads):
        lo = h * head_size
        qh = q[:, lo:lo + head_size].astype(mxu_dtype)     # [S, dh]
        kh = k[:, lo:lo + head_size].astype(mxu_dtype)     # [S, dh]
        vh = v[:, lo:lo + head_size].astype(mxu_dtype)     # [S, dh]

        # scores = qh @ kh^T without materializing a transpose.
        scores = lax.dot_general(
            qh, kh,
            dimension_numbers=(((1,), (1,)), ((), ())),
            preferred_element_type=jnp.float32)            # [S, S] f32
        scores = scores + mask                             # additive mask

        # Numerically-stable softmax over keys (f32).
        m = jnp.max(scores, axis=-1, keepdims=True)
        p = jnp.exp(scores - m)
        denom = jnp.sum(p, axis=-1, keepdims=True)
        probs = p * pl.reciprocal(denom, approx=True)      # EUP reciprocal

        # (dropout is identity in eval mode)
        ctx = jnp.dot(probs.astype(mxu_dtype), vh,
                      preferred_element_type=jnp.float32)  # [S, dh] f32
        out_ref[0, :, lo:lo + head_size] = ctx.astype(out_ref.dtype)


def self_attention(hidden_states, attention_mask, params,
                   num_heads, head_size, *, mxu_dtype=jnp.bfloat16):
    """hidden_states: [B, S, H] f32; attention_mask: [B, 1, 1, S] f32 (additive)."""
    B, S, H = hidden_states.shape
    wq, bq, wk, bk, wv, bv = params
    scale = 1.0 / math.sqrt(head_size)

    # Host-side prep (cheap XLA ops, done once):
    #  - transpose torch-layout [out, in] weights to [in, out]
    #  - fold the softmax scale into the Q weight/bias
    #  - fuse Q/K/V into a single [H, 3H] weight and [1, 3H] bias
    w_qkv = jnp.concatenate([wq.T * scale, wk.T, wv.T], axis=1).astype(mxu_dtype)
    b_qkv = jnp.concatenate([bq * scale, bk, bv]).reshape(1, 3 * H).astype(jnp.float32)

    # Drop the degenerate head/query dims of the mask on the host.
    mask2d = attention_mask.reshape(B, 1, S).astype(jnp.float32)

    kernel = functools.partial(_self_attention_kernel,
                               num_heads=num_heads,
                               head_size=head_size,
                               hidden_size=H)

    return pl.pallas_call(
        kernel,
        out_shape=jax.ShapeDtypeStruct((B, S, H), hidden_states.dtype),
        grid_spec=pltpu.PrefetchScalarGridSpec(
            num_scalar_prefetch=0,
            grid=(B,),
            in_specs=[
                pl.BlockSpec((1, S, H), lambda b: (b, 0, 0)),      # x (per batch)
                pl.BlockSpec((1, 1, S), lambda b: (b, 0, 0)),      # additive mask
                pl.BlockSpec((H, 3 * H), lambda b: (0, 0)),        # fused W_qkv
                pl.BlockSpec((1, 3 * H), lambda b: (0, 0)),        # fused b_qkv
            ],
            out_specs=pl.BlockSpec((1, S, H), lambda b: (b, 0, 0)),
        ),
        compiler_params=pltpu.CompilerParams(
            dimension_semantics=("parallel",),
            vmem_limit_bytes=32 * 1024 * 1024,
        ),
    )(hidden_states, mask2d, w_qkv, b_qkv)


def reference_self_attention(x, mask, params, num_heads, head_size):
    """Pure-JAX f32 reference mirroring the torch module."""
    B, S, H = x.shape
    wq, bq, wk, bk, wv, bv = params
    q = x @ wq.T + bq
    k = x @ wk.T + bk
    v = x @ wv.T + bv

    def split(t):  # [B,S,H] -> [B,nh,S,dh]
        return t.reshape(B, S, num_heads, head_size).transpose(0, 2, 1, 3)

    qh, kh, vh = split(q), split(k), split(v)
    scores = jnp.einsum('bhqd,bhkd->bhqk', qh, kh) / math.sqrt(head_size)
    scores = scores + mask                          # [B,1,1,S] broadcast
    probs = jax.nn.softmax(scores, axis=-1)
    ctx = jnp.einsum('bhqk,bhkd->bhqd', probs, vh)
    return ctx.transpose(0, 2, 1, 3).reshape(B, S, H)


if __name__ == "__main__":
    # module config
    hidden_size = 32
    num_attention_heads = 4
    attention_probs_dropout_prob = 0.0   # eval-mode / identity dropout
    head_size = hidden_size // num_attention_heads

    # small input shapes
    B, S, H = 2, 8, hidden_size

    key = jax.random.PRNGKey(0)
    kx, km, k1, k2, k3, k4, k5, k6 = jax.random.split(key, 8)

    hidden_states = jax.random.normal(kx, (B, S, H), dtype=jnp.float32)
    # additive mask: 0 for attend, -10000 for masked (BERT convention)
    mask_bits = (jax.random.uniform(km, (B, 1, 1, S)) > 0.2).astype(jnp.float32)
    attention_mask = (1.0 - mask_bits) * -10000.0

    # deterministic parameter init (torch Linear-style uniform bound)
    bound = 1.0 / math.sqrt(hidden_size)
    wq = jax.random.uniform(k1, (H, H), minval=-bound, maxval=bound, dtype=jnp.float32)
    wk = jax.random.uniform(k2, (H, H), minval=-bound, maxval=bound, dtype=jnp.float32)
    wv = jax.random.uniform(k3, (H, H), minval=-bound, maxval=bound, dtype=jnp.float32)
    bq = jax.random.uniform(k4, (H,), minval=-bound, maxval=bound, dtype=jnp.float32)
    bk = jax.random.uniform(k5, (H,), minval=-bound, maxval=bound, dtype=jnp.float32)
    bv = jax.random.uniform(k6, (H,), minval=-bound, maxval=bound, dtype=jnp.float32)
    params = (wq, bq, wk, bk, wv, bv)

    out = self_attention(hidden_states, attention_mask, params,
                         num_attention_heads, head_size)
    out = jax.block_until_ready(out)

    ref = reference_self_attention(hidden_states, attention_mask, params,
                                   num_attention_heads, head_size)
    assert out.shape == (B, S, H)
    # bf16 MXU operands (+ approx reciprocal) => loosened tolerance vs f32 ref.
    assert jnp.allclose(out, ref, atol=2e-2, rtol=2e-2), (
        "mismatch vs reference, max abs diff = %s" % jnp.max(jnp.abs(out - ref)))

    print("KERNEL_OK")
</pallas_src>

<mosaic_0001>
module attributes {stable_mosaic.version = 11 : i64} {
  func.func @_self_attention_kernel(%arg0: i32, %arg1: memref<1x8x32xf32, #tpu.memory_space<vmem>>, %arg2: memref<1x1x8xf32, #tpu.memory_space<vmem>>, %arg3: memref<32x96xbf16, #tpu.memory_space<vmem>>, %arg4: memref<1x96xf32, #tpu.memory_space<vmem>>, %arg5: memref<1x8x32xf32, #tpu.memory_space<vmem>>) attributes {dimension_semantics = [#tpu.dimension_semantics<parallel>], iteration_bounds = array<i64: 2>, scalar_prefetch = 0 : i64, scratch_operands = 0 : i64, tpu.core_type = #tpu.core_type<tc>, window_params = [{transform_indices = @transform_0, window_bounds = array<i64: 1, 8, 32>}, {transform_indices = @transform_1, window_bounds = array<i64: 1, 1, 8>}, {pipeline_mode = #tpu.pipeline_mode<synchronous>, transform_indices = @transform_2, window_bounds = array<i64: 32, 96>}, {pipeline_mode = #tpu.pipeline_mode<synchronous>, transform_indices = @transform_3, window_bounds = array<i64: 1, 96>}, {transform_indices = @transform_4, window_bounds = array<i64: 1, 8, 32>}]} {
    %c0 = arith.constant 0 : index
    %c0_0 = arith.constant 0 : index
    %c0_1 = arith.constant 0 : index
    %0 = vector.load %arg1[%c0, %c0_0, %c0_1] : memref<1x8x32xf32, #tpu.memory_space<vmem>>, vector<1x8x32xf32>
    %1 = vector.shape_cast %0 : vector<1x8x32xf32> to vector<8x32xf32>
    %2 = arith.truncf %1 : vector<8x32xf32> to vector<8x32xbf16>
    %c0_2 = arith.constant 0 : index
    %c0_3 = arith.constant 0 : index
    %3 = vector.load %arg3[%c0_2, %c0_3] : memref<32x96xbf16, #tpu.memory_space<vmem>>, vector<32x96xbf16>
    %cst = arith.constant dense<0.000000e+00> : vector<8x96xf32>
    %4 = tpu.matmul %2, %3, %cst {dimension_numbers = #tpu.dot_dimension_numbers<[1], [0], [0], [1], [0, 0, 1, 1], [], []>} : vector<8x32xbf16>, vector<32x96xbf16>, vector<8x96xf32> -> vector<8x96xf32>
    %c0_4 = arith.constant 0 : index
    %c0_5 = arith.constant 0 : index
    %5 = vector.load %arg4[%c0_4, %c0_5] : memref<1x96xf32, #tpu.memory_space<vmem>>, vector<1x96xf32>
    %6 = vector.broadcast %5 : vector<1x96xf32> to vector<8x96xf32>
    %7 = arith.addf %4, %6 : vector<8x96xf32>
    %8 = vector.extract_strided_slice %7 {offsets = [0, 0], sizes = [8, 32], strides = [1, 1]} : vector<8x96xf32> to vector<8x32xf32>
    %9 = vector.extract_strided_slice %7 {offsets = [0, 32], sizes = [8, 32], strides = [1, 1]} : vector<8x96xf32> to vector<8x32xf32>
    %10 = vector.extract_strided_slice %7 {offsets = [0, 64], sizes = [8, 32], strides = [1, 1]} : vector<8x96xf32> to vector<8x32xf32>
    %c0_6 = arith.constant 0 : index
    %c0_7 = arith.constant 0 : index
    %c0_8 = arith.constant 0 : index
    %11 = vector.load %arg2[%c0_6, %c0_7, %c0_8] : memref<1x1x8xf32, #tpu.memory_space<vmem>>, vector<1x1x8xf32>
    %12 = vector.shape_cast %11 : vector<1x1x8xf32> to vector<1x8xf32>
    %13 = vector.extract_strided_slice %8 {offsets = [0, 0], sizes = [8, 8], strides = [1, 1]} : vector<8x32xf32> to vector<8x8xf32>
    %14 = arith.truncf %13 : vector<8x8xf32> to vector<8x8xbf16>
    %15 = vector.extract_strided_slice %9 {offsets = [0, 0], sizes = [8, 8], strides = [1, 1]} : vector<8x32xf32> to vector<8x8xf32>
    %16 = arith.truncf %15 : vector<8x8xf32> to vector<8x8xbf16>
    %17 = vector.extract_strided_slice %10 {offsets = [0, 0], sizes = [8, 8], strides = [1, 1]} : vector<8x32xf32> to vector<8x8xf32>
    %18 = arith.truncf %17 : vector<8x8xf32> to vector<8x8xbf16>
    %cst_9 = arith.constant dense<0.000000e+00> : vector<8x8xf32>
    %19 = tpu.matmul %14, %16, %cst_9 {dimension_numbers = #tpu.dot_dimension_numbers<[1], [1], [0], [0], [0, 0, 1, 0], [], []>} : vector<8x8xbf16>, vector<8x8xbf16>, vector<8x8xf32> -> vector<8x8xf32>
    %20 = vector.broadcast %12 : vector<1x8xf32> to vector<8x8xf32>
    %21 = arith.addf %19, %20 : vector<8x8xf32>
    %cst_10 = arith.constant dense<0xFF800000> : vector<8xf32>
    %22 = vector.multi_reduction <maximumf>, %21, %cst_10 [1] : vector<8x8xf32> to vector<8xf32>
    %23 = vector.shape_cast %22 : vector<8xf32> to vector<8x1xf32>
    %24 = vector.broadcast %23 : vector<8x1xf32> to vector<8x8xf32>
    %25 = arith.subf %21, %24 : vector<8x8xf32>
    %26 = math.exp %25 : vector<8x8xf32>
    %cst_11 = arith.constant dense<0.000000e+00> : vector<8xf32>
    %27 = vector.multi_reduction <add>, %26, %cst_11 [1] : vector<8x8xf32> to vector<8xf32>
    %28 = vector.shape_cast %27 : vector<8xf32> to vector<8x1xf32>
    %29 = tpu.reciprocal %28 {approx = true} : vector<8x1xf32> -> vector<8x1xf32>
    %30 = vector.broadcast %29 : vector<8x1xf32> to vector<8x8xf32>
    %31 = arith.mulf %26, %30 : vector<8x8xf32>
    %32 = arith.truncf %31 : vector<8x8xf32> to vector<8x8xbf16>
    %cst_12 = arith.constant dense<0.000000e+00> : vector<8x8xf32>
    %33 = tpu.matmul %32, %18, %cst_12 {dimension_numbers = #tpu.dot_dimension_numbers<[1], [0], [0], [1], [0, 0, 1, 1], [], []>} : vector<8x8xbf16>, vector<8x8xbf16>, vector<8x8xf32> -> vector<8x8xf32>
    %c0_13 = arith.constant 0 : index
    %c0_14 = arith.constant 0 : index
    %c0_15 = arith.constant 0 : index
    %34 = vector.load %arg5[%c0_13, %c0_14, %c0_15] : memref<1x8x32xf32, #tpu.memory_space<vmem>>, vector<1x8x8xf32>
    %35 = vector.shape_cast %34 : vector<1x8x8xf32> to vector<8x8xf32>
    %36 = vector.shape_cast %33 : vector<8x8xf32> to vector<1x8x8xf32>
    tpu.vector_store %arg5[%c0_13, %c0_14, %c0_15], %36 {strides = array<i32>} : memref<1x8x32xf32, #tpu.memory_space<vmem>>, vector<1x8x8xf32>,
    %37 = vector.extract_strided_slice %8 {offsets = [0, 8], sizes = [8, 8], strides = [1, 1]} : vector<8x32xf32> to vector<8x8xf32>
    %38 = arith.truncf %37 : vector<8x8xf32> to vector<8x8xbf16>
    %39 = vector.extract_strided_slice %9 {offsets = [0, 8], sizes = [8, 8], strides = [1, 1]} : vector<8x32xf32> to vector<8x8xf32>
    %40 = arith.truncf %39 : vector<8x8xf32> to vector<8x8xbf16>
    %41 = vector.extract_strided_slice %10 {offsets = [0, 8], sizes = [8, 8], strides = [1, 1]} : vector<8x32xf32> to vector<8x8xf32>
    %42 = arith.truncf %41 : vector<8x8xf32> to vector<8x8xbf16>
    %cst_16 = arith.constant dense<0.000000e+00> : vector<8x8xf32>
    %43 = tpu.matmul %38, %40, %cst_16 {dimension_numbers = #tpu.dot_dimension_numbers<[1], [1], [0], [0], [0, 0, 1, 0], [], []>} : vector<8x8xbf16>, vector<8x8xbf16>, vector<8x8xf32> -> vector<8x8xf32>
    %44 = vector.broadcast %12 : vector<1x8xf32> to vector<8x8xf32>
    %45 = arith.addf %43, %44 : vector<8x8xf32>
    %cst_17 = arith.constant dense<0xFF800000> : vector<8xf32>
    %46 = vector.multi_reduction <maximumf>, %45, %cst_17 [1] : vector<8x8xf32> to vector<8xf32>
    %47 = vector.shape_cast %46 : vector<8xf32> to vector<8x1xf32>
    %48 = vector.broadcast %47 : vector<8x1xf32> to vector<8x8xf32>
    %49 = arith.subf %45, %48 : vector<8x8xf32>
    %50 = math.exp %49 : vector<8x8xf32>
    %cst_18 = arith.constant dense<0.000000e+00> : vector<8xf32>
    %51 = vector.multi_reduction <add>, %50, %cst_18 [1] : vector<8x8xf32> to vector<8xf32>
    %52 = vector.shape_cast %51 : vector<8xf32> to vector<8x1xf32>
    %53 = tpu.reciprocal %52 {approx = true} : vector<8x1xf32> -> vector<8x1xf32>
    %54 = vector.broadcast %53 : vector<8x1xf32> to vector<8x8xf32>
    %55 = arith.mulf %50, %54 : vector<8x8xf32>
    %56 = arith.truncf %55 : vector<8x8xf32> to vector<8x8xbf16>
    %cst_19 = arith.constant dense<0.000000e+00> : vector<8x8xf32>
    %57 = tpu.matmul %56, %42, %cst_19 {dimension_numbers = #tpu.dot_dimension_numbers<[1], [0], [0], [1], [0, 0, 1, 1], [], []>} : vector<8x8xbf16>, vector<8x8xbf16>, vector<8x8xf32> -> vector<8x8xf32>
    %c0_20 = arith.constant 0 : index
    %c0_21 = arith.constant 0 : index
    %c8 = arith.constant 8 : index
    %58 = vector.load %arg5[%c0_20, %c0_21, %c8] : memref<1x8x32xf32, #tpu.memory_space<vmem>>, vector<1x8x8xf32>
    %59 = vector.shape_cast %58 : vector<1x8x8xf32> to vector<8x8xf32>
    %60 = vector.shape_cast %57 : vector<8x8xf32> to vector<1x8x8xf32>
    tpu.vector_store %arg5[%c0_20, %c0_21, %c8], %60 {strides = array<i32>} : memref<1x8x32xf32, #tpu.memory_space<vmem>>, vector<1x8x8xf32>,
    %61 = vector.extract_strided_slice %8 {offsets = [0, 16], sizes = [8, 8], strides = [1, 1]} : vector<8x32xf32> to vector<8x8xf32>
    %62 = arith.truncf %61 : vector<8x8xf32> to vector<8x8xbf16>
    %63 = vector.extract_strided_slice %9 {offsets = [0, 16], sizes = [8, 8], strides = [1, 1]} : vector<8x32xf32> to vector<8x8xf32>
    %64 = arith.truncf %63 : vector<8x8xf32> to vector<8x8xbf16>
    %65 = vector.extract_strided_slice %10 {offsets = [0, 16], sizes = [8, 8], strides = [1, 1]} : vector<8x32xf32> to vector<8x8xf32>
    %66 = arith.truncf %65 : vector<8x8xf32> to vector<8x8xbf16>
    %cst_22 = arith.constant dense<0.000000e+00> : vector<8x8xf32>
    %67 = tpu.matmul %62, %64, %cst_22 {dimension_numbers = #tpu.dot_dimension_numbers<[1], [1], [0], [0], [0, 0, 1, 0], [], []>} : vector<8x8xbf16>, vector<8x8xbf16>, vector<8x8xf32> -> vector<8x8xf32>
    %68 = vector.broadcast %12 : vector<1x8xf32> to vector<8x8xf32>
    %69 = arith.addf %67, %68 : vector<8x8xf32>
    %cst_23 = arith.constant dense<0xFF800000> : vector<8xf32>
    %70 = vector.multi_reduction <maximumf>, %69, %cst_23 [1] : vector<8x8xf32> to vector<8xf32>
    %71 = vector.shape_cast %70 : vector<8xf32> to vector<8x1xf32>
    %72 = vector.broadcast %71 : vector<8x1xf32> to vector<8x8xf32>
    %73 = arith.subf %69, %72 : vector<8x8xf32>
    %74 = math.exp %73 : vector<8x8xf32>
    %cst_24 = arith.constant dense<0.000000e+00> : vector<8xf32>
    %75 = vector.multi_reduction <add>, %74, %cst_24 [1] : vector<8x8xf32> to vector<8xf32>
    %76 = vector.shape_cast %75 : vector<8xf32> to vector<8x1xf32>
    %77 = tpu.reciprocal %76 {approx = true} : vector<8x1xf32> -> vector<8x1xf32>
    %78 = vector.broadcast %77 : vector<8x1xf32> to vector<8x8xf32>
    %79 = arith.mulf %74, %78 : vector<8x8xf32>
    %80 = arith.truncf %79 : vector<8x8xf32> to vector<8x8xbf16>
    %cst_25 = arith.constant dense<0.000000e+00> : vector<8x8xf32>
    %81 = tpu.matmul %80, %66, %cst_25 {dimension_numbers = #tpu.dot_dimension_numbers<[1], [0], [0], [1], [0, 0, 1, 1], [], []>} : vector<8x8xbf16>, vector<8x8xbf16>, vector<8x8xf32> -> vector<8x8xf32>
    %c0_26 = arith.constant 0 : index
    %c0_27 = arith.constant 0 : index
    %c16 = arith.constant 16 : index
    %82 = vector.load %arg5[%c0_26, %c0_27, %c16] : memref<1x8x32xf32, #tpu.memory_space<vmem>>, vector<1x8x8xf32>
    %83 = vector.shape_cast %82 : vector<1x8x8xf32> to vector<8x8xf32>
    %84 = vector.shape_cast %81 : vector<8x8xf32> to vector<1x8x8xf32>
    tpu.vector_store %arg5[%c0_26, %c0_27, %c16], %84 {strides = array<i32>} : memref<1x8x32xf32, #tpu.memory_space<vmem>>, vector<1x8x8xf32>,
    %85 = vector.extract_strided_slice %8 {offsets = [0, 24], sizes = [8, 8], strides = [1, 1]} : vector<8x32xf32> to vector<8x8xf32>
    %86 = arith.truncf %85 : vector<8x8xf32> to vector<8x8xbf16>
    %87 = vector.extract_strided_slice %9 {offsets = [0, 24], sizes = [8, 8], strides = [1, 1]} : vector<8x32xf32> to vector<8x8xf32>
    %88 = arith.truncf %87 : vector<8x8xf32> to vector<8x8xbf16>
    %89 = vector.extract_strided_slice %10 {offsets = [0, 24], sizes = [8, 8], strides = [1, 1]} : vector<8x32xf32> to vector<8x8xf32>
    %90 = arith.truncf %89 : vector<8x8xf32> to vector<8x8xbf16>
    %cst_28 = arith.constant dense<0.000000e+00> : vector<8x8xf32>
    %91 = tpu.matmul %86, %88, %cst_28 {dimension_numbers = #tpu.dot_dimension_numbers<[1], [1], [0], [0], [0, 0, 1, 0], [], []>} : vector<8x8xbf16>, vector<8x8xbf16>, vector<8x8xf32> -> vector<8x8xf32>
    %92 = vector.broadcast %12 : vector<1x8xf32> to vector<8x8xf32>
    %93 = arith.addf %91, %92 : vector<8x8xf32>
    %cst_29 = arith.constant dense<0xFF800000> : vector<8xf32>
    %94 = vector.multi_reduction <maximumf>, %93, %cst_29 [1] : vector<8x8xf32> to vector<8xf32>
    %95 = vector.shape_cast %94 : vector<8xf32> to vector<8x1xf32>
    %96 = vector.broadcast %95 : vector<8x1xf32> to vector<8x8xf32>
    %97 = arith.subf %93, %96 : vector<8x8xf32>
    %98 = math.exp %97 : vector<8x8xf32>
    %cst_30 = arith.constant dense<0.000000e+00> : vector<8xf32>
    %99 = vector.multi_reduction <add>, %98, %cst_30 [1] : vector<8x8xf32> to vector<8xf32>
    %100 = vector.shape_cast %99 : vector<8xf32> to vector<8x1xf32>
    %101 = tpu.reciprocal %100 {approx = true} : vector<8x1xf32> -> vector<8x1xf32>
    %102 = vector.broadcast %101 : vector<8x1xf32> to vector<8x8xf32>
    %103 = arith.mulf %98, %102 : vector<8x8xf32>
    %104 = arith.truncf %103 : vector<8x8xf32> to vector<8x8xbf16>
    %cst_31 = arith.constant dense<0.000000e+00> : vector<8x8xf32>
    %105 = tpu.matmul %104, %90, %cst_31 {dimension_numbers = #tpu.dot_dimension_numbers<[1], [0], [0], [1], [0, 0, 1, 1], [], []>} : vector<8x8xbf16>, vector<8x8xbf16>, vector<8x8xf32> -> vector<8x8xf32>
    %c0_32 = arith.constant 0 : index
    %c0_33 = arith.constant 0 : index
    %c24 = arith.constant 24 : index
    %106 = vector.load %arg5[%c0_32, %c0_33, %c24] : memref<1x8x32xf32, #tpu.memory_space<vmem>>, vector<1x8x8xf32>
    %107 = vector.shape_cast %106 : vector<1x8x8xf32> to vector<8x8xf32>
    %108 = vector.shape_cast %105 : vector<8x8xf32> to vector<1x8x8xf32>
    tpu.vector_store %arg5[%c0_32, %c0_33, %c24], %108 {strides = array<i32>} : memref<1x8x32xf32, #tpu.memory_space<vmem>>, vector<1x8x8xf32>,
    return
  }
  func.func @transform_0(%arg0: i32) -> (i32, i32, i32) {
    %c0_i32 = arith.constant 0 : i32
    %c0_i32_0 = arith.constant 0 : i32
    %c0_i32_1 = arith.constant 0 : i32
    return %arg0, %c0_i32, %c0_i32_0 : i32, i32, i32
  }
  func.func @transform_1(%arg0: i32) -> (i32, i32, i32) {
    %c0_i32 = arith.constant 0 : i32
    %c0_i32_0 = arith.constant 0 : i32
    %c0_i32_1 = arith.constant 0 : i32
    return %arg0, %c0_i32, %c0_i32_0 : i32, i32, i32
  }
  func.func @transform_2(%arg0: i32) -> (i32, i32) {
    %c0_i32 = arith.constant 0 : i32
    %c0_i32_0 = arith.constant 0 : i32
    %c0_i32_1 = arith.constant 0 : i32
    return %c0_i32, %c0_i32_0 : i32, i32
  }
  func.func @transform_3(%arg0: i32) -> (i32, i32) {
    %c0_i32 = arith.constant 0 : i32
    %c0_i32_0 = arith.constant 0 : i32
    %c0_i32_1 = arith.constant 0 : i32
    return %c0_i32, %c0_i32_0 : i32, i32
  }
  func.func @transform_4(%arg0: i32) -> (i32, i32, i32) {
    %c0_i32 = arith.constant 0 : i32
    %c0_i32_0 = arith.constant 0 : i32
    %c0_i32_1 = arith.constant 0 : i32
    return %arg0, %c0_i32, %c0_i32_0 : i32, i32, i32
  }
}

</mosaic_0001>

<bundles_post_ra>
// kernel: tpu_custom_call.1
= control target key start
LH: loop header
LB: loop body
LE: loop exit
PB: predicated region body
PF: predicated region fallthrough
CT: control target
= control target key end

     0   :  { %9 = vsyncpa [#allocation3], 0  ;;  %s1603_s0 = inlined_call_operand.hbm [shape: f32[2,8,32], index: 0, kind: input, shape index: {}]   ;;  %s1604_s1 = inlined_call_operand.hbm [shape: f32[2,1,8], index: 1, kind: input, shape index: {}]   ;;  %s1605_s2 = inlined_call_operand.hbm [shape: bf16[32,96], index: 2, kind: input, shape index: {}]   ;;  %s1606_s3 = inlined_call_operand.vmem [shape: f32[1,96], index: 3, kind: input, shape index: {}]   ;;  %s1607_s4 = inlined_call_operand.hbm [shape: f32[2,8,32], index: 4, kind: output, shape index: {}]  }
   0x1   :  { %11 = vsyncpa [#allocation3 + $0x1], 0 }
   0x2   :  { %12 = vsyncpa [#allocation6], 0 }
   0x3   :  { %14 = vsyncpa [#allocation6 + $0x1], 0 }
   0x4   :  { %15 = vsyncpa [#allocation4], 0 }
   0x5   :  { %17 = vsyncpa [#allocation4 + $0x1], 0  ;;  %s1316_s15 = smov 0   ;;  %s1318_s16 = smov 0  }
   0x6   :  { %s1320_s17 = smov 0   ;;  %s1322_s18 = smov 0  }
   0x7 LB: > { %s1337_s19 = sadd.s32 4294967295, %s1267_s18   ;;  %s912_s20 = sadd.s32 4294967294, %s1267_s18   ;;  %s1267_s18 = sphi %s1322_s18, %s1629_s18   ;;  %s1263_s17 = sphi %s1320_s17, %s1628_s17   ;;  %s1259_s16 = sphi %s1318_s16, %s1627_s16   ;;  %s1255_s15 = sphi %s1316_s15, %s1626_s15  }
   0x8   : > { %p43_p0 = scmp.ne.s32.totalorder %s1259_s16, %s1255_s15  ;;  %p1608_p1 = scmp.eq.s32.totalorder %s1337_s19, 0 }
   0x9   : > { %p141_p3 = scmp.eq.s32.totalorder %s912_s20, 1  ;;  %p913_p5 = scmp.ge.s32.totalorder %s1267_s18, 1 }
   0xa   : > { %p1346_p4 = por %p1608_p1, %p43_p0  ;;  %p148_p7 = scmp.lt.s32.totalorder %s1267_s18, 3 }
   0xb   : > { %p1351_p6 = por %p141_p3, %p43_p0  ;;  %s1269_s24 = smov [#allocation7]  }
   0xc   : > { %s1612_s21 = scalar_select %p1346_p4, 1, 0 }
   0xd   : > { %s1613_s22 = scalar_select %p1351_p6, 1, 0 }
   0xe   : > { %p1356_p8 = pnand %p913_p5, %p148_p7  ;;  %s160_s25 = sshll.u32 %s1269_s24, 4  ;;  %s161_s25 = int_to_ptr.vmem [resolvable:$true] %s160_s25 }
   0xf   : > { %s1370_s27 = sadd.s32 1, %s1267_s18   ;;  %s30_s28 = sadd.s32 1, %s1263_s17 }
  0x10   : > { %s1614_s23 = scalar_select %p1356_p8, 1, 0 }
  0x11   : > { %p1025_p9 = pneg %p1356_p8  ;;  %s27_s29 = ssub.s32 %s1267_s18, %s1370_s27 }
  0x12   : > { %s1124_s30 = scalar_lea.vmem %s161_s25, 256  ;;  %p1132_p5 = scmp.lt.s32.totalorder %s161_s25, %s161_s25 }
  0x13   : > { %p1365_p11 = pnand %p1025_p9, %p1608_p1  ;;  %p1125_p13 = scmp.ne.s32.totalorder %s161_s25, %s1124_s30 }
  0x14   : > { %p1133_p7 = scmp.lt.s32.totalorder %s1124_s30, %s1124_s30 }
  0x15   : > { %p1115_p12 = pneg %p1365_p11 }
  0x16   : > { %p1134_p10 = por %p1133_p7, %p1132_p5 }
  0x17   : > { %p1127_p0 = pnand %p1125_p13, %p1115_p12 }
  0x19   : > { %p1128_p3 = pneg %p1127_p0 }
  0x1b   : > { %p1135_p2 = pnand %p1134_p10, %p1128_p3 }
  0x1d   : > { %1138 = shalt.err (!%p1135_p2)
}
  0x1e   : > { %s1270_s5 = smov 64   ;;  %s1271_s6 = smov 4  }
  0x1f   : > { %1028 = dma.hbm_to_vmem [thread:$0]  (!%p1365_p11), %s1605_s2, 256, %s161_s25, [#allocation6], %s1270_s5, %s1270_s5, %s1271_s6  }
  0x20   : > { %p28_p9 = scmp.eq.s32.totalorder %s27_s29, 0  ;;  %p37_p10 = scmp.ne.s32.totalorder %s1263_s17, %s1259_s16 }
  0x21   : > { %p38_p2 = scmp.eq.s32.totalorder %s1267_s18, 0  ;;  %p1041_p12 = scmp.lt.s32.totalorder %s1267_s18, 2 }
  0x22   : > { %s1387_s9 = scalar_select %p28_p9, %s1263_s17, %s30_s28  }
  0x23   : > { %p39_p13 = por %p38_p2, %p37_p10  ;;  %p1616_p0 = scmp.eq.s32.totalorder %s1337_s19, 1 }
  0x24   : > { %s1396_s11 = sand.u32 1, %s1263_s17   ;;  %s917_s12 = sshll.u32 %s1267_s18, 7 }
  0x25   : > { %p1391_p3 = por %p1616_p0, %p37_p10  ;;  %s916_s13 = sshll.u32 %s1396_s11, 3 }
  0x26   : > { %s1403_s24 = scalar_lea.hbm %s1603_s0, %s917_s12  ;;  %s181_s25 = scalar_lea.vmem [#allocation2], %s916_s13 }
  0x27   : > { %s1617_s10 = scalar_select %p1391_p3, 1, 0 }
  0x28   : > { %s188_s26 = sshll.u32 %s181_s25, 4  ;;  %p1405_p11 = pnand %p1041_p12, %p39_p13  ;;  %s189_s26 = int_to_ptr.vmem [resolvable:$true] %s188_s26 }
  0x29   : > { %s195_s29 = sand.u32 1, %s1267_s18   ;;  %s178_s30 = scalar_lea.sflag [#allocation3], %s1396_s11 }
  0x2a   : > { %s1139_s5 = scalar_lea.hbm %s1403_s24, 128  ;;  %p1141_p7 = pneg %p1405_p11 }
  0x2b   : > { %p1140_p5 = scmp.ne.s32.totalorder %s1403_s24, %s1139_s5  ;;  %s1144_s8 = scalar_lea.hbm %s1603_s0, 256 }
  0x2c   : > { %p1145_p2 = scmp.lt.s32.totalorder %s1403_s24, %s1603_s0  ;;  %p1146_p12 = scmp.lt.s32.totalorder %s1144_s8, %s1139_s5 }
  0x2d   : > { %p1142_p9 = pnand %p1141_p7, %p1140_p5 }
  0x2e   : > { %p1147_p13 = por %p1146_p12, %p1145_p2 }
  0x2f   : > { %p1143_p10 = pneg %p1142_p9 }
  0x31   : > { %p1148_p0 = pnand %p1147_p13, %p1143_p10 }
  0x33   : > { %1151 = shalt.err (!%p1148_p0)
}
  0x34   : > { %s1152_s14 = scalar_lea.vmem %s189_s26, 128  ;;  %s1272_s20 = smov [#allocation2]  }
  0x35   : > { %p1153_p1 = scmp.ne.s32.totalorder %s189_s26, %s1152_s14  ;;  %s1157_s25 = sshll.u32 %s1272_s20, 4  ;;  %s1158_s25 = int_to_ptr.vmem [resolvable:$false] %s1157_s25 }
  0x36   : > { %s1159_s6 = scalar_lea.vmem %s1158_s25, 256  ;;  %p1160_p9 = scmp.lt.s32.totalorder %s189_s26, %s1158_s25 }
  0x37   : > { %p1155_p6 = pnand %p1153_p1, %p1141_p7  ;;  %p1161_p3 = scmp.lt.s32.totalorder %s1159_s6, %s1152_s14 }
  0x39   : > { %p1156_p5 = pneg %p1155_p6  ;;  %p1162_p4 = por %p1161_p3, %p1160_p9 }
  0x3b   : > { %p1163_p8 = pnand %p1162_p4, %p1156_p5 }
  0x3d   : > { %1166 = shalt.err (!%p1163_p8)
}
  0x3e   : > { %1032 = dma.hbm_to_vmem [thread:$0]  (!%p1405_p11), %s1403_s24, 128, %s189_s26, %s178_s30  }
  0x3f   : > { %s918_s5 = sshll.u32 %s1267_s18, 4  ;;  %s198_s13 = scalar_lea.vmem [#allocation5], %s1396_s11 }
  0x40   : > { %s1435_s12 = scalar_lea.hbm %s1604_s1, %s918_s5  ;;  %s205_s14 = sshll.u32 %s198_s13, 4  ;;  %s206_s14 = int_to_ptr.vmem [resolvable:$true] %s205_s14 }
  0x41   : > { %s196_s20 = scalar_lea.sflag [#allocation6], %s195_s29  ;;  %s1167_s25 = scalar_lea.hbm %s1435_s12, 16 }
  0x42   : > { %p1168_p1 = scmp.ne.s32.totalorder %s1435_s12, %s1167_s25  ;;  %s1172_s30 = scalar_lea.hbm %s1604_s1, 32 }
  0x43   : > { %p1173_p8 = scmp.lt.s32.totalorder %s1435_s12, %s1604_s1  ;;  %p1174_p3 = scmp.lt.s32.totalorder %s1172_s30, %s1167_s25 }
  0x44   : > { %p1170_p4 = pnand %p1168_p1, %p1141_p7 }
  0x45   : > { %p1175_p10 = por %p1174_p3, %p1173_p8 }
  0x46   : > { %p1171_p6 = pneg %p1170_p4 }
  0x48   : > { %p1176_p2 = pnand %p1175_p10, %p1171_p6 }
  0x4a   : > { %1179 = shalt.err (!%p1176_p2)
}
  0x4b   : > { %s1180_s11 = scalar_lea.vmem %s206_s14, 16  ;;  %s1273_s29 = smov [#allocation5]  }
  0x4c   : > { %p1181_p12 = scmp.ne.s32.totalorder %s206_s14, %s1180_s11  ;;  %s1185_s7 = sshll.u32 %s1273_s29, 4  ;;  %s1186_s7 = int_to_ptr.vmem [resolvable:$false] %s1185_s7 }
  0x4d   : > { %s1187_s8 = scalar_lea.vmem %s1186_s7, 32  ;;  %p1188_p5 = scmp.lt.s32.totalorder %s206_s14, %s1186_s7 }
  0x4e   : > { %p1183_p13 = pnand %p1181_p12, %p1141_p7  ;;  %p1189_p9 = scmp.lt.s32.totalorder %s1187_s8, %s1180_s11 }
  0x50   : > { %p1184_p0 = pneg %p1183_p13  ;;  %p1190_p1 = por %p1189_p9, %p1188_p5 }
  0x52   : > { %p1191_p4 = pnand %p1190_p1, %p1184_p0 }
  0x54   : > { %1194 = shalt.err (!%p1191_p4)
}
  0x55   : > { %1035 = dma.hbm_to_vmem [thread:$0]  (!%p1405_p11), %s1435_s12, 16, %s206_s14, %s196_s20  }
  0x56   : > { %p1619_p6 = scmp.ne.s32.totalorder %s1614_s23, 0 }
  0x57   : > { %s1461_s13 = sand.u32 (!%p1619_p6), 1, %s1259_s16   ;;  %p1620_p7 = scmp.ne.s32.totalorder (!%p1619_p6), %s1612_s21, 0 }
  0x58   : > { %214 = sbr.rel (%p1619_p6) target bundleno = 1321 (0x529), region = 36  ;;  %s920_s25 = sshll.u32 (!%p1619_p6), %s1461_s13, 3 }
  0x59   : > { %s217_s24 = scalar_lea.sflag (!%p1619_p6), [#allocation3], %s1461_s13  ;;  %s220_s26 = scalar_lea.vmem (!%p1619_p6), [#allocation2], %s920_s25 }
  0x5d   : > { %1238 = dma.done.wait (%p1620_p7), %s217_s24, 128  }
  0x5e   : > { %1240 = vsyncadd (%p1620_p7), %s217_s24, 4294967168  ;;  %s225_s23 = sand.u32 1, %s1337_s19   ;;  %s228_s12 = scalar_lea.vmem [#allocation5], %s1461_s13 }
  0x5f   : > { %s226_s28 = scalar_lea.sflag [#allocation6], %s225_s23 }
  0x60   : > { %1242 = dma.done.wait (%p1620_p7), %s226_s28, 16  }
  0x61   : > { %1244 = vsyncadd (%p1620_p7), %s226_s28, 4294967280  ;;  %p1621_p11 = scmp.eq.s32.totalorder %s1337_s19, 0 }
  0x63   : > { %1246 = dma.done.wait (%p1621_p11), [#allocation6], 256   ;;  %p1622_p8 = pmov %p1621_p11 }
  0x64   : > { %v1274_v0 = vmov 0.0   ;;  %vm1275_vm0 = vmmov 0   ;;  %v1095_v1 = vld [vmem:[#allocation7 + $0x8] sm:$0xff]   ;;  %v1096_v2 = vld [vmem:[#allocation7] sm:$0xff]   ;;  %vm287_vm1 = vcmask 261120   ;;  %s1276_s20 = smov 120  }
  0x65   : > { %1248 = vsyncadd (%p1622_p8), [#allocation6], 4294967040  ;;  %959 = vmatprep.subr.bf16.mxu0 %v1274_v0  ;;  %963 = vmatprep.mubr.msk.bf16.mxu0 %vm1275_vm0, %v1274_v0  ;;  %v262_v3 = vld [vmem:[%s220_s26] sm:$0xff]  ;;  %s1277_s30 = smov 96   ;;  %s1278_s6 = smov 80   ;;  %vm342_vm2 = vcmask 64512  }
  0x66   : > { %967 = vmatprep.subr.bf16.mxu1 %v1274_v0  ;;  %969 = vmatprep.mubr.msk.bf16.mxu1 %vm1275_vm0, %v1274_v0  ;;  %v263_v4 = vpack.c.bf16 %v262_v3, %v262_v3  ;;  %v923_v5 = vld [vmem:[%s1606_s3] ss:$0 sm:$0xff]  ;;  %s1279_s5 = smov 88   ;;  %s1280_s11 = smov 72   ;;  %vm406_vm3 = vcmask 1043456   ;;  %vm565_vm4 = vcmask 130112  }
  0x67   : > { %960 = vmatpush3.bf16.msra.mxu0 %v1095_v1  ;;  %s1281_s29 = smov 112   ;;  %s1282_s7 = smov 104   ;;  %v927_v23 = vld [vmem:[%s228_s12] ss:$0 sm:$0xff]  ;;  %vm681_vm5 = vcmask 195712   ;;  %vm797_vm6 = vcmask 261312  }
  0x68   : > { %961 = vmatprep.subr.bf16.mxu0 %v1274_v0  ;;  %s1283_s8 = smov 56   ;;  %s1284_s24 = smov 64  }
  0x69   : > { %s1285_s26 = smov 40   ;;  %s1286_s23 = smov 48  }
  0x6a   : > { %s1554_s28 = scalar_lea.vmem [#allocation8], %s920_s25  ;;  %s1287_s12 = smov 8  }
  0x6b   : > { %962 = vmatpush3.bf16.msra.mxu0 %v1096_v2  ;;  %s1288_s21 = smov 16   ;;  %s1289_s25 = smov 24  }
  0x6c   : > { %973 = vmatprep.subr.bf16.mxu0 %v1274_v0  ;;  %s937_s14 = sshll.u32 %s1337_s19, 7  ;;  %p1623_p10 = scmp.ne.s32.totalorder %s1617_s10, 0 }
  0x6e   : > { %964 = vmatmul.mubr.msk.bf16.vlgmr.msra.gmra.mxu0 %vm287_vm1, %v263_v4 }
  0x6f   : > { %975 = vmatprep.mubr.msk.bf16.mxu0 %vm1275_vm0, %v1274_v0 }
 0x12e   : > { %v325_v6 = vpop.f32.mrf.mxu0 }
 0x12f   : > { %v326_v7 = vadd.f32 %v923_v5, %v325_v6 }
 0x130   : > { %v965_v8 = vpop.f32.mrf.mxu0 }
 0x131   : > { %v1494_v9 = vpack.c.bf16 %v326_v7, %v326_v7 }
 0x132   : > { %v328_v10 = vpop.f32.mrf.mxu0 }
 0x133   : > { %451 = vrot.lane.b32.xlu1 %v1494_v9, %s1276_s20  ;;  %340 = vrot.lane.b32.xlu0 %v1494_v9, %s1277_s30  ;;  %s813_s20 = sshll.u32 %s1554_s28, 4  ;;  %s814_s20 = int_to_ptr.vmem [resolvable:$true] %s813_s20 }
 0x134   : > { %v966_v11 = vpop.f32.mrf.mxu0 }
 0x137   : > { %569 = vrot.lane.b32.xlu1 %v1494_v9, %s1278_s6  ;;  %453 = vrot.lane.b32.xlu0 %v1494_v9, %s1279_s5  ;;  %s1565_s5 = scalar_lea.hbm %s1607_s4, %s937_s14 }
 0x13b   : > { %685 = vrot.lane.b32.xlu1 %v1494_v9, %s1280_s11  ;;  %567 = vrot.lane.b32.xlu0 %v1494_v9, %s1281_s29  ;;  %s800_s11 = scalar_lea.sflag [#allocation4], %s1461_s13  ;;  %s1195_s29 = scalar_lea.vmem %s814_s20, 128 }
 0x13c   : > { %p1196_p3 = scmp.ne.s32.totalorder %s814_s20, %s1195_s29 }
 0x13e   : > { %p1197_p2 = pnand %p1196_p3, %p1623_p10 }
 0x13f   : > { %683 = vrot.lane.b32.xlu0 %v1494_v9, %s1282_s7  ;;  %s1290_s7 = smov [#allocation8]  }
 0x140   : > { %p1198_p12 = pneg %p1197_p2 }
 0x1a5   : > { %v341_v12 = vpop.permute.xlu0 %340  ;;  %v452_v15 = vpop.permute.xlu1 %451 }
 0x1a6   : > { %v347_v13 = vsel %vm342_vm2, %v341_v12, 0 }
 0x1a7   : > { %968 = vmatpush3.bf16.xpose.msra.mxu1 %v347_v13 }
 0x1a8   : > { %979 = vmatprep.subr.bf16.mxu1 %v1274_v0 }
 0x1a9   : > { %v454_v14 = vpop.permute.xlu0 %453  ;;  %v570_v17 = vpop.permute.xlu1 %569 }
 0x1aa   : > { %v459_v16 = vsel %vm342_vm2, %v454_v14, 0  ;;  %v575_v18 = vsel %vm342_vm2, %v570_v17, 0 }
 0x1ad   : > { %v686_v19 = vpop.permute.xlu1 %685  ;;  %v568_v20 = vpop.permute.xlu0 %567 }
 0x1ae   : > { %970 = vmatmul.mubr.msk.bf16.vlgmr.msra.gmra.mxu1 %vm342_vm2, %v1494_v9  ;;  %v691_v21 = vsel %vm342_vm2, %v686_v19, 0 }
 0x1af   : > { %980 = vmatpush3.bf16.xpose.msra.mxu1 %v459_v16  ;;  %981 = vmatprep.mubr.msk.bf16.mxu1 %vm1275_vm0, %v1274_v0 }
 0x1b0   : > { %991 = vmatprep.subr.bf16.mxu1 %v1274_v0 }
 0x1b1   : > { %v684_v22 = vpop.permute.xlu0 %683 }
 0x1b6   : > { %982 = vmatmul.mubr.msk.bf16.vlgmr.msra.gmra.mxu1 %vm342_vm2, %v452_v15 }
 0x1b7   : > { %992 = vmatpush3.bf16.xpose.msra.mxu1 %v575_v18  ;;  %993 = vmatprep.mubr.msk.bf16.mxu1 %vm1275_vm0, %v1274_v0 }
 0x1b8   : > { %1003 = vmatprep.subr.bf16.mxu1 %v1274_v0 }
 0x1be   : > { %994 = vmatmul.mubr.msk.bf16.vlgmr.msra.gmra.mxu1 %vm342_vm2, %v568_v20 }
 0x1bf   : > { %1004 = vmatpush3.bf16.xpose.msra.mxu1 %v691_v21  ;;  %1005 = vmatprep.mubr.msk.bf16.mxu1 %vm1275_vm0, %v1274_v0 }
 0x1c6   : > { %1006 = vmatmul.mubr.msk.bf16.vlgmr.msra.gmra.mxu1 %vm342_vm2, %v684_v22 }
 0x26e   : > { %v383_v24 = vpop.f32.mrf.mxu1 }
 0x26f   : > { %v384_v25 = vadd.f32 %v927_v23, %v383_v24 }
 0x270   : > { %v971_v26 = vpop.f32.mrf.mxu1 }
 0x271   : > { %v389_v27 = vsel %vm342_vm2, %v384_v25, -inf }
 0x272   : > { %390 = vmax.xlane.f32.xlu1 %v389_v27  ;;  %v386_v28 = vpop.f32.mrf.mxu1 }
 0x274   : > { %v972_v29 = vpop.f32.mrf.mxu1 }
 0x276   : > { %v495_v30 = vpop.f32.mrf.mxu1 }
 0x277   : > { %v496_v31 = vadd.f32 %v927_v23, %v495_v30 }
 0x278   : > { %v983_v32 = vpop.f32.mrf.mxu1 }
 0x279   : > { %v501_v33 = vsel %vm342_vm2, %v496_v31, -inf }
 0x27a   : > { %502 = vmax.xlane.f32.xlu0 %v501_v33  ;;  %v498_v34 = vpop.f32.mrf.mxu1 }
 0x27c   : > { %v984_v35 = vpop.f32.mrf.mxu1 }
 0x27e   : > { %v611_v36 = vpop.f32.mrf.mxu1 }
 0x27f   : > { %v612_v37 = vadd.f32 %v927_v23, %v611_v36 }
 0x280   : > { %v995_v38 = vpop.f32.mrf.mxu1 }
 0x281   : > { %v617_v39 = vsel %vm342_vm2, %v612_v37, -inf }
 0x282   : > { %618 = vmax.xlane.f32.xlu0 %v617_v39  ;;  %v614_v40 = vpop.f32.mrf.mxu1 }
 0x284   : > { %v996_v41 = vpop.f32.mrf.mxu1 }
 0x286   : > { %v727_v42 = vpop.f32.mrf.mxu1 }
 0x287   : > { %v728_v43 = vadd.f32 %v927_v23, %v727_v42 }
 0x288   : > { %v1007_v44 = vpop.f32.mrf.mxu1 }
 0x289   : > { %v733_v45 = vsel %vm342_vm2, %v728_v43, -inf }
 0x28a   : > { %734 = vmax.xlane.f32.xlu1 %v733_v45  ;;  %v730_v46 = vpop.f32.mrf.mxu1 }
 0x28c   : > { %v1008_v47 = vpop.f32.mrf.mxu1 }
 0x2fb   : > { %v391_v48 = vpop.xlane.xlu1 %390 }
 0x2fc   : > { %v392_v49 = vsub.f32 %v384_v25, %v391_v48 }
 0x2fe   : > { %v393_v50 = vmul.f32 1.442695, %v392_v49 }
 0x300   : > { %1097 = vpow2.f32 %v393_v50 }
 0x303   : > { %v503_v51 = vpop.xlane.xlu0 %502 }
 0x304   : > { %v504_v52 = vsub.f32 %v496_v31, %v503_v51 }
 0x306   : > { %v505_v53 = vmul.f32 1.442695, %v504_v52 }
 0x308   : > { %1099 = vpow2.f32 %v505_v53 }
 0x30b   : > { %v619_v54 = vpop.xlane.xlu0 %618 }
 0x30c   : > { %v620_v55 = vsub.f32 %v612_v37, %v619_v54 }
 0x30d   : > { %v1098_v56 = vpop.eup %1097 }
 0x30e   : > { %v621_v57 = vmul.f32 1.442695, %v620_v55  ;;  %v395_v58 = vsel %vm342_vm2, %v1098_v56, 0.0 }
 0x30f   : > { %396 = vadd.xlane.f32.xlu0 %v395_v58 }
 0x310   : > { %1101 = vpow2.f32 %v621_v57 }
 0x313   : > { %v735_v63 = vpop.xlane.xlu1 %734 }
 0x314   : > { %v736_v1 = vsub.f32 %v728_v43, %v735_v63 }
 0x315   : > { %v1100_v59 = vpop.eup %1099 }
 0x316   : > { %v507_v60 = vsel %vm342_vm2, %v1100_v59, 0.0  ;;  %v737_v2 = vmul.f32 1.442695, %v736_v1 }
 0x317   : > { %508 = vadd.xlane.f32.xlu1 %v507_v60 }
 0x318   : > { %1103 = vpow2.f32 %v737_v2 }
 0x31d   : > { %v1102_v61 = vpop.eup %1101 }
 0x31e   : > { %v623_v62 = vsel %vm342_vm2, %v1102_v61, 0.0 }
 0x31f   : > { %624 = vadd.xlane.f32.xlu0 %v623_v62 }
 0x325   : > { %v1104_v3 = vpop.eup %1103 }
 0x326   : > { %v739_v4 = vsel %vm342_vm2, %v1104_v3, 0.0 }
 0x328   : > { %513 = vrot.lane.b32.xlu1 %v1494_v9, %s1283_s8  ;;  %s1199_s8 = sshll.u32 %s1290_s7, 4  ;;  %s1200_s8 = int_to_ptr.vmem [resolvable:$false] %s1199_s8 }
 0x329   : > { %s1201_s19 = scalar_lea.vmem %s1200_s8, 256  ;;  %p1202_p13 = scmp.lt.s32.totalorder %s814_s20, %s1200_s8 }
 0x32a   : > { %p1203_p0 = scmp.lt.s32.totalorder %s1201_s19, %s1195_s29 }
 0x32c   : > { %p1204_p5 = por %p1203_p0, %p1202_p13 }
 0x32e   : > { %p1205_p9 = pnand %p1204_p5, %p1198_p12 }
 0x335   : > { %401 = vrot.lane.b32.xlu0 %v1494_v9, %s1284_s24 }
 0x339   : > { %745 = vrot.lane.b32.xlu0 %v1494_v9, %s1285_s26 }
 0x34c   : > { %740 = vadd.xlane.f32.xlu1 %v739_v4 }
 0x35d   : > { %629 = vrot.lane.b32.xlu1 %v1494_v9, %s1286_s23 }
 0x398   : > { %v397_v5 = vpop.xlane.xlu0 %396 }
 0x399   : > { %1105 = vrcp.f32 %v397_v5 }
 0x3a0   : > { %v509_v6 = vpop.xlane.xlu1 %508 }
 0x3a1   : > { %1107 = vrcp.f32 %v509_v6 }
 0x3a4   : > { %v514_v13 = vpop.permute.xlu1 %513 }
 0x3a5   : > { %v519_v16 = vsel %vm406_vm3, %v514_v13, 0 }
 0x3a6   : > { %v1106_v7 = vpop.eup %1105 }
 0x3a7   : > { %v399_v10 = vmul.f32 %v1106_v7, %v1098_v56 }
 0x3a8   : > { %v625_v8 = vpop.xlane.xlu0 %624 }
 0x3a9   : > { %v400_v14 = vpack.c.bf16 %v399_v10, %v399_v10  ;;  %1109 = vrcp.f32 %v625_v8 }
 0x3ac   : > { %v402_v11 = vpop.permute.xlu0 %401 }
 0x3ad   : > { %v408_v12 = vsel %vm406_vm3, %v402_v11, 0 }
 0x3ae   : > { %974 = vmatpush3.bf16.msra.mxu0 %v408_v12  ;;  %v1108_v15 = vpop.eup %1107 }
 0x3af   : > { %985 = vmatprep.subr.bf16.mxu0 %v1274_v0  ;;  %v511_v9 = vmul.f32 %v1108_v15, %v1100_v59 }
 0x3b0   : > { %v746_v23 = vpop.permute.xlu0 %745 }
 0x3b1   : > { %976 = vmatmul.mubr.msk.bf16.vlgmr.msra.gmra.mxu0 %vm342_vm2, %v400_v14  ;;  %v512_v17 = vpack.c.bf16 %v511_v9, %v511_v9  ;;  %v751_v25 = vsel %vm406_vm3, %v746_v23, 0 }
 0x3b2   : > { %986 = vmatpush3.bf16.msra.mxu0 %v519_v16  ;;  %987 = vmatprep.mubr.msk.bf16.mxu0 %vm1275_vm0, %v1274_v0 }
 0x3b3   : > { %997 = vmatprep.subr.bf16.mxu0 %v1274_v0 }
 0x3b6   : > { %v1110_v18 = vpop.eup %1109 }
 0x3b7   : > { %v627_v20 = vmul.f32 %v1110_v18, %v1102_v61 }
 0x3b9   : > { %988 = vmatmul.mubr.msk.bf16.vlgmr.msra.gmra.mxu0 %vm342_vm2, %v512_v17  ;;  %v628_v24 = vpack.c.bf16 %v627_v20, %v627_v20 }
 0x3ba   : > { %999 = vmatprep.mubr.msk.bf16.mxu0 %vm1275_vm0, %v1274_v0 }
 0x3d5   : > { %v741_v19 = vpop.xlane.xlu1 %740 }
 0x3d6   : > { %1111 = vrcp.f32 %v741_v19 }
 0x3d9   : > { %v630_v21 = vpop.permute.xlu1 %629 }
 0x3da   : > { %v635_v22 = vsel %vm406_vm3, %v630_v21, 0 }
 0x3db   : > { %998 = vmatpush3.bf16.msra.mxu0 %v635_v22 }
 0x3dc   : > { %1009 = vmatprep.subr.bf16.mxu0 %v1274_v0 }
 0x3de   : > { %1000 = vmatmul.mubr.msk.bf16.vlgmr.msra.gmra.mxu0 %vm342_vm2, %v628_v24 }
 0x3df   : > { %1010 = vmatpush3.bf16.msra.mxu0 %v751_v25  ;;  %1011 = vmatprep.mubr.msk.bf16.mxu0 %vm1275_vm0, %v1274_v0 }
 0x3e3   : > { %v1112_v26 = vpop.eup %1111 }
 0x3e4   : > { %v743_v27 = vmul.f32 %v1112_v26, %v1104_v3 }
 0x3e6   : > { %v744_v28 = vpack.c.bf16 %v743_v27, %v743_v27 }
 0x3e8   : > { %1012 = vmatmul.mubr.msk.bf16.vlgmr.msra.gmra.mxu0 %vm342_vm2, %v744_v28 }
 0x471   : > { %v444_v29 = vpop.f32.mrf.mxu0 }
 0x472   : > { %450 = vst.msk [vmem:[%s1554_s28] sm:$0xff] %vm342_vm2, %v444_v29 }
 0x473   : > { %v977_v30 = vpop.f32.mrf.mxu0 }
 0x475   : > { %v447_v31 = vpop.f32.mrf.mxu0 }
 0x477   : > { %v978_v32 = vpop.f32.mrf.mxu0 }
 0x479   : > { %v555_v33 = vpop.f32.mrf.mxu0 }
 0x47a   : > { %562 = vrot.lane.b32.xlu1 %v555_v33, %s1287_s12 }
 0x47b   : > { %v989_v34 = vpop.f32.mrf.mxu0 }
 0x47d   : > { %v558_v0 = vpop.f32.mrf.mxu0 }
 0x47f   : > { %v990_v35 = vpop.f32.mrf.mxu0 }
 0x49e   : > { %v671_v36 = vpop.f32.mrf.mxu0 }
 0x49f   : > { %678 = vrot.lane.b32.xlu0 %v671_v36, %s1288_s21 }
 0x4a0   : > { %v1001_v37 = vpop.f32.mrf.mxu0 }
 0x4a2   : > { %v674_v38 = vpop.f32.mrf.mxu0 }
 0x4a4   : > { %v1002_v39 = vpop.f32.mrf.mxu0 }
 0x4a8   : > { %v787_v40 = vpop.f32.mrf.mxu0 }
 0x4a9   : > { %794 = vrot.lane.b32.xlu1 %v787_v40, %s1289_s25 }
 0x4aa   : > { %v1013_v41 = vpop.f32.mrf.mxu0 }
 0x4ac   : > { %v790_v42 = vpop.f32.mrf.mxu0 }
 0x4ae   : > { %v1014_v43 = vpop.f32.mrf.mxu0 }
 0x4ec   : > { %v563_v44 = vpop.permute.xlu1 %562 }
 0x4ed   : > { %566 = vst.msk [vmem:[%s1554_s28] sm:$0xff] %vm565_vm4, %v563_v44 }
 0x511   : > { %v679_v45 = vpop.permute.xlu0 %678 }
 0x512   : > { %682 = vst.msk [vmem:[%s1554_s28] sm:$0xff] %vm681_vm5, %v679_v45 }
 0x51b   : > { %v795_v46 = vpop.permute.xlu1 %794 }
 0x51c   : > { %798 = vst.msk [vmem:[%s1554_s28] sm:$0xff] %vm797_vm6, %v795_v46 }
 0x51d   : > { %1208 = shalt.err (!%p1205_p9)
}
 0x51e   : > { %s1209_s24 = scalar_lea.hbm %s1565_s5, 128  ;;  %s1213_s23 = scalar_lea.hbm %s1607_s4, 256 }
 0x51f   : > { %p1210_p1 = scmp.ne.s32.totalorder %s1565_s5, %s1209_s24  ;;  %p1214_p7 = scmp.lt.s32.totalorder %s1565_s5, %s1607_s4 }
 0x520   : > { %p1215_p11 = scmp.lt.s32.totalorder %s1213_s23, %s1209_s24 }
 0x521   : > { %p1211_p4 = pnand %p1210_p1, %p1623_p10 }
 0x522   : > { %p1216_p8 = por %p1215_p11, %p1214_p7 }
 0x523   : > { %p1212_p6 = pneg %p1211_p4 }
 0x525   : > { %p1217_p3 = pnand %p1216_p8, %p1212_p6 }
 0x527   : > { %1220 = shalt.err (!%p1217_p3)
}
 0x528   : > { %1023 = dma.vmem_to_hbm [thread:$0]  (%p1623_p10), %s814_s20, 128, %s1565_s5, %s800_s11  }
 0x529 PF: > { %s825_s21 = sand.u32 1, %s1255_s15   ;;  %p1624_p2 = scmp.ne.s32.totalorder %s1613_s22, 0 }
 0x52a   : > { %p1625_p12 = scmp.ge.s32.totalorder %s1267_s18, 2  ;;  %s826_s25 = scalar_lea.sflag [#allocation4], %s825_s21 }
 0x52c   : > { %p1037_p13 = pnand %p1625_p12, %p1624_p2 }
 0x52e   : > { %p1038_p0 = pneg %p1037_p13 }
 0x530   : > { %1250 = dma.done.wait (%p1038_p0), %s826_s25, 128  }
 0x531   : > { %1252 = vsyncadd (%p1038_p0), %s826_s25, 4294967168  ;;  %p20_p5 = scmp.ge.s32.totalorder %s1370_s27, 4   ;;  %s1626_s15 = smov %s1259_s16 }
 0x532   : > { %s1627_s16 = smov %s1263_s17  ;;  %s1628_s17 = smov %s1387_s9 }
 0x533   : > { %s1629_s18 = smov %s1370_s27  ;;  %22 = sbr.rel (!%p20_p5) target bundleno = 7 (0x7), region = 98 }
 0x538   :  { %831 = vsyncpa [#allocation3], 1 }
 0x539   :  { %833 = vsyncpa [#allocation3 + $0x1], 1 }
 0x53a   :  { %834 = vsyncpa [#allocation6], 1 }
 0x53b   :  { %836 = vsyncpa [#allocation6 + $0x1], 1 }
 0x53c   :  { %837 = vsyncpa [#allocation4], 1 }
 0x53d   :  { %839 = vsyncpa [#allocation4 + $0x1], 1 }

</bundles_post_ra>
